<compile_context>
chip_gen: v7x
topology: tpu7x:2x2x1
jax: 0.10.0
libtpu: 0.0.40
codegen_flags: <defaults>
</compile_context>

<pallas_src>
import functools

import jax
import jax.numpy as jnp
from jax import lax
from jax.experimental import pallas as pl
from jax.experimental.pallas import tpu as pltpu

EPS = 1e-5                       # FrozenBatchNorm2d eps
COMPUTE_DTYPE = jnp.bfloat16     # activation / MXU input dtype (f32 accumulation)
_VMEM_LIMIT = 48 * 1024 * 1024   # <= v7x 64 MiB physical; above v5e/v6e scoped defaults
_RESIDENT_WEIGHT_BYTES = 8 * 1024 * 1024  # bf16 weight kept fully VMEM-resident below this


def _round_up(x, m):
    return (x + m - 1) // m * m


def _pick_tile(size, candidates):
    """Largest candidate tile that divides `size`, else the full dimension."""
    for c in candidates:
        if size % c == 0:
            return c
    return size


def _pick_tm(mp, kdim_p):
    """Largest M tile dividing mp whose bf16 patch tile stays within a VMEM budget."""
    budget = 3 * 1024 * 1024
    for c in (512, 256, 128):
        if mp % c == 0 and c * kdim_p * 2 <= budget:
            return c
    return 128  # mp is always a multiple of 128


# ----------------------------------------------------------------------------
# Pallas kernels
# ----------------------------------------------------------------------------
def _frozen_bn_kernel(x_ref, s_ref, b_ref, o_ref):
    # x_ref: (TR, C) channels-last tile; s_ref/b_ref: (1, C) f32 lane-dense,
    # constant index_map -> loaded once.  Compute in f32, cast only the result.
    y = x_ref[...].astype(jnp.float32) * s_ref[...] + b_ref[...]
    o_ref[...] = y.astype(o_ref.dtype)


def _conv_bn_resident_kernel(*refs, relu, has_res):
    """Matmul with the full (K, N) weight resident in VMEM; fused bias(+res)(+ReLU).

    refs = (p_ref(TM,K) bf16, w_ref(K,N) bf16 [BN scale pre-folded], b_ref(1,N) f32,
            [r_ref(TM,N) bf16 residual,] o_ref(TM,N) bf16)
    """
    if has_res:
        p_ref, w_ref, b_ref, r_ref, o_ref = refs
    else:
        p_ref, w_ref, b_ref, o_ref = refs
    y = jnp.dot(p_ref[...], w_ref[...], preferred_element_type=jnp.float32)
    y = y + b_ref[...]
    if has_res:
        y = y + r_ref[...].astype(jnp.float32)
    if relu:
        y = jnp.maximum(y, 0.0)
    o_ref[...] = y.astype(o_ref.dtype)


def _conv_bn_ktiled_kernel(*refs, relu, has_res):
    """K-tiled fallback: f32 VMEM accumulator, pl.when init/epilogue.

    refs = (p_ref(TM,TK), w_ref(TK,TN), b_ref(1,TN), [r_ref(TM,TN),]
            o_ref(TM,TN), acc_ref(TM,TN) f32 scratch)
    """
    if has_res:
        p_ref, w_ref, b_ref, r_ref, o_ref, acc_ref = refs
    else:
        p_ref, w_ref, b_ref, o_ref, acc_ref = refs

    k = pl.program_id(2)

    @pl.when(k == 0)
    def _():
        acc_ref[...] = jnp.zeros_like(acc_ref)

    acc_ref[...] += jnp.dot(p_ref[...], w_ref[...],
                            preferred_element_type=jnp.float32)

    @pl.when(k == pl.num_programs(2) - 1)
    def _():
        y = acc_ref[...] + b_ref[...]
        if has_res:
            y = y + r_ref[...].astype(jnp.float32)
        if relu:
            y = jnp.maximum(y, 0.0)
        o_ref[...] = y.astype(o_ref.dtype)


# ----------------------------------------------------------------------------
# FrozenBatchNorm2d — the spec module itself (exact, f32 math, NCHW in/out)
# ----------------------------------------------------------------------------
def _frozen_bn_2d(x2d, scale_f32, shift_f32):
    """x2d: (rows, C) channels-last. scale/shift: (C,) f32. Returns x2d dtype."""
    rows, c = x2d.shape
    itemsize = jnp.dtype(x2d.dtype).itemsize
    budget = 2 * 1024 * 1024
    divisors = [t for t in (4096, 2048, 1024, 512, 256, 128, 64, 32, 16, 8)
                if rows % t == 0]
    tr = rows
    for t in divisors:
        if t * c * itemsize <= budget:
            tr = t
            break
    else:
        if divisors:
            tr = divisors[-1]

    s_row = scale_f32.reshape(1, c).astype(jnp.float32)
    b_row = shift_f32.reshape(1, c).astype(jnp.float32)

    return pl.pallas_call(
        _frozen_bn_kernel,
        out_shape=jax.ShapeDtypeStruct((rows, c), x2d.dtype),
        grid=(rows // tr,),
        in_specs=[
            pl.BlockSpec((tr, c), lambda i: (i, 0)),
            pl.BlockSpec((1, c), lambda i: (0, 0)),   # loaded once (constant index)
            pl.BlockSpec((1, c), lambda i: (0, 0)),
        ],
        out_specs=pl.BlockSpec((tr, c), lambda i: (i, 0)),
        compiler_params=pltpu.CompilerParams(dimension_semantics=("parallel",)),
    )(x2d, s_row, b_row)


def frozen_batchnorm2d(x_nchw, weight, bias, running_mean, running_var):
    """y = x * scale + bias with scale = w*rsqrt(var+eps), bias = b - mean*scale.
    NCHW interface matching the PyTorch module; kernel runs channels-last so the
    per-channel scale/bias are a single lane-dense block."""
    n, c, h, w = x_nchw.shape
    scale = (weight * lax.rsqrt(running_var + EPS)).astype(jnp.float32)
    shift = (bias.astype(jnp.float32) - running_mean.astype(jnp.float32) * scale)

    x2d = jnp.transpose(x_nchw, (0, 2, 3, 1)).reshape(n * h * w, c)
    y2d = _frozen_bn_2d(x2d, scale, shift)
    return jnp.transpose(y2d.reshape(n, h, w, c), (0, 3, 1, 2))


def frozen_batchnorm2d_nhwc(x_nhwc, weight, bias, running_mean, running_var):
    """Channels-last fast path (no transposes)."""
    n, h, w, c = x_nhwc.shape
    scale = (weight * lax.rsqrt(running_var + EPS)).astype(jnp.float32)
    shift = (bias.astype(jnp.float32) - running_mean.astype(jnp.float32) * scale)
    y2d = _frozen_bn_2d(x_nhwc.reshape(n * h * w, c), scale, shift)
    return y2d.reshape(n, h, w, c)


# ----------------------------------------------------------------------------
# Conv2d (no bias) + folded FrozenBN (+ residual) (+ ReLU)
# ----------------------------------------------------------------------------
def conv_bn(x, weight, bn, *, stride=1, padding=0, relu=True, residual=None):
    """x: NHWC (bf16). weight: PyTorch layout (Cout, Cin, kh, kw) f32.
    bn = (gamma, beta, running_mean, running_var). Optional residual (NHWC,
    output-shaped) is added before the ReLU inside the kernel epilogue."""
    cout, cin, kh, kw = weight.shape
    n, h, w, c = x.shape
    assert c == cin

    ho = (h + 2 * padding - kh) // stride + 1
    wo = (w + 2 * padding - kw) // stride + 1
    m = n * ho * wo
    kdim = kh * kw * cin

    # MXU / lane-friendly padded extents (zeros contribute nothing to the dot).
    kdim_p = _round_up(kdim, 128)
    cout_p = _round_up(cout, 128)
    mp = _round_up(max(m, 128), 128)

    # Fold FrozenBatchNorm2d into the weights (scale) and a bias vector.
    gamma, beta, mean, var = bn
    scale = gamma * lax.rsqrt(var + EPS)
    bias = beta - mean * scale
    wmat = jnp.transpose(weight, (2, 3, 1, 0)).reshape(kdim, cout) * scale[None, :]
    if kdim_p != kdim or cout_p != cout:
        wmat = jnp.pad(wmat, ((0, kdim_p - kdim), (0, cout_p - cout)))
    wmat = wmat.astype(COMPUTE_DTYPE)
    bias_row = jnp.pad(bias, (0, cout_p - cout)).reshape(1, cout_p).astype(jnp.float32)

    # Patch extraction (glue). 1x1 convs need no im2col at all.
    if kh == 1 and kw == 1:
        xs = x if stride == 1 else x[:, ::stride, ::stride, :]
        patches = xs.reshape(m, kdim)
    else:
        # TODO(synk): im2col materialized in HBM; in-kernel tap formation would
        # remove ~k*k x activation HBM traffic (matters most on v5e).
        xp = jnp.pad(x, ((0, 0), (padding, padding), (padding, padding), (0, 0)))
        cols = []
        for ki in range(kh):
            for kj in range(kw):
                cols.append(lax.slice(
                    xp, (0, ki, kj, 0),
                    (n, ki + stride * (ho - 1) + 1,
                     kj + stride * (wo - 1) + 1, cin),
                    (1, stride, stride, 1)))
        patches = jnp.concatenate(cols, axis=-1).reshape(m, kdim)
    patches = patches.astype(COMPUTE_DTYPE)
    if mp != m or kdim_p != kdim:
        patches = jnp.pad(patches, ((0, mp - m), (0, kdim_p - kdim)))

    has_res = residual is not None
    in_arrays = [patches, wmat, bias_row]
    if has_res:
        r = residual.reshape(m, cout).astype(COMPUTE_DTYPE)
        if mp != m or cout_p != cout:
            r = jnp.pad(r, ((0, mp - m), (0, cout_p - cout)))
        in_arrays.append(r)

    weight_bytes = kdim_p * cout_p * 2
    if weight_bytes <= _RESIDENT_WEIGHT_BYTES:
        # Resident-weight path: 1-D grid over M, full K and N each step.
        # Weight index_map is constant -> the strip is DMA'd from HBM once.
        tm = _pick_tm(mp, kdim_p)
        grid = (mp // tm,)
        in_specs = [
            pl.BlockSpec((tm, kdim_p), lambda i: (i, 0)),
            pl.BlockSpec((kdim_p, cout_p), lambda i: (0, 0)),
            pl.BlockSpec((1, cout_p), lambda i: (0, 0)),
        ]
        if has_res:
            in_specs.append(pl.BlockSpec((tm, cout_p), lambda i: (i, 0)))
        out_specs = pl.BlockSpec((tm, cout_p), lambda i: (i, 0))
        kernel = functools.partial(_conv_bn_resident_kernel, relu=relu, has_res=has_res)
        scratch = []
        dims = ("parallel",)
    else:
        # K-tiled fallback for weights too large to keep resident.
        tm = _pick_tile(mp, (256, 128))
        tn = _pick_tile(cout_p, (256, 128))
        tk = _pick_tile(kdim_p, (512, 256, 128))
        grid = (mp // tm, cout_p // tn, kdim_p // tk)
        in_specs = [
            pl.BlockSpec((tm, tk), lambda i, j, k: (i, k)),
            pl.BlockSpec((tk, tn), lambda i, j, k: (k, j)),
            pl.BlockSpec((1, tn), lambda i, j, k: (0, j)),
        ]
        if has_res:
            in_specs.append(pl.BlockSpec((tm, tn), lambda i, j, k: (i, j)))
        out_specs = pl.BlockSpec((tm, tn), lambda i, j, k: (i, j))
        kernel = functools.partial(_conv_bn_ktiled_kernel, relu=relu, has_res=has_res)
        scratch = [pltpu.VMEM((tm, tn), jnp.float32)]
        dims = ("parallel", "parallel", "arbitrary")

    out = pl.pallas_call(
        kernel,
        out_shape=jax.ShapeDtypeStruct((mp, cout_p), COMPUTE_DTYPE),
        grid=grid,
        in_specs=in_specs,
        out_specs=out_specs,
        scratch_shapes=scratch,
        compiler_params=pltpu.CompilerParams(
            dimension_semantics=dims,
            vmem_limit_bytes=_VMEM_LIMIT),
    )(*in_arrays)

    if mp != m or cout_p != cout:
        out = out[:m, :cout]
    return out.reshape(n, ho, wo, cout)


def maxpool_3x3_s2(x):
    # PyTorch MaxPool2d(kernel_size=3, stride=2, padding=1) on NHWC (glue, one use).
    return lax.reduce_window(
        x, jnp.array(-jnp.inf, x.dtype), lax.max,
        window_dimensions=(1, 3, 3, 1),
        window_strides=(1, 2, 2, 1),
        padding=((0, 0), (1, 1), (1, 1), (0, 0)),
    )


# ----------------------------------------------------------------------------
# Deterministic parameter construction (resnet50 with FrozenBatchNorm2d)
# ----------------------------------------------------------------------------
def _init_conv(key, cout, cin, kh, kw):
    fan_in = cin * kh * kw
    std = (2.0 / fan_in) ** 0.5
    return std * jax.random.normal(key, (cout, cin, kh, kw), jnp.float32)


def _init_bn(nchan):
    # FrozenBatchNorm2d buffers: weight=1, bias=0, running_mean=0, running_var=1
    return (jnp.ones(nchan, jnp.float32), jnp.zeros(nchan, jnp.float32),
            jnp.zeros(nchan, jnp.float32), jnp.ones(nchan, jnp.float32))


def make_resnet50_params(key):
    keys = iter(jax.random.split(key, 64))
    params = {"stem": {"w": _init_conv(next(keys), 64, 3, 7, 7), "bn": _init_bn(64)}}
    blocks_per_stage = [3, 4, 6, 3]
    planes_per_stage = [64, 128, 256, 512]
    in_ch = 64
    for s, (nb, planes) in enumerate(zip(blocks_per_stage, planes_per_stage)):
        stage = []
        for b in range(nb):
            blk = {
                "conv1": {"w": _init_conv(next(keys), planes, in_ch, 1, 1), "bn": _init_bn(planes)},
                "conv2": {"w": _init_conv(next(keys), planes, planes, 3, 3), "bn": _init_bn(planes)},
                "conv3": {"w": _init_conv(next(keys), planes * 4, planes, 1, 1), "bn": _init_bn(planes * 4)},
            }
            if b == 0:
                blk["down"] = {"w": _init_conv(next(keys), planes * 4, in_ch, 1, 1), "bn": _init_bn(planes * 4)}
            stage.append(blk)
            in_ch = planes * 4
        params[f"layer{s + 1}"] = stage
    return params


# ----------------------------------------------------------------------------
# Forward pass
# ----------------------------------------------------------------------------
def _bottleneck(x, blk, stride):
    if "down" in blk:
        identity = conv_bn(x, blk["down"]["w"], blk["down"]["bn"],
                           stride=stride, padding=0, relu=False)
    else:
        identity = x
    out = conv_bn(x, blk["conv1"]["w"], blk["conv1"]["bn"], relu=True)
    out = conv_bn(out, blk["conv2"]["w"], blk["conv2"]["bn"],
                  stride=stride, padding=1, relu=True)
    # conv3 + FrozenBN + residual add + ReLU fused in one kernel epilogue.
    out = conv_bn(out, blk["conv3"]["w"], blk["conv3"]["bn"],
                  relu=True, residual=identity)
    return out


@jax.jit
def backbone_forward(params, images_nchw):
    """Backbone.forward up to (xs, mask).
    xs = [C1(64), C2(256), C3(512), C4(1024), C5(2048)] NCHW f32;
    mask = zeros_like(xs[-1][:, 0], dtype=bool)."""
    x = jnp.transpose(images_nchw, (0, 2, 3, 1)).astype(COMPUTE_DTYPE)  # NCHW -> NHWC

    x = conv_bn(x, params["stem"]["w"], params["stem"]["bn"],
                stride=2, padding=3, relu=True)
    x = maxpool_3x3_s2(x)
    feats = [x]

    stage_strides = [1, 2, 2, 2]
    for s in range(4):
        for b, blk in enumerate(params[f"layer{s + 1}"]):
            x = _bottleneck(x, blk, stride=stage_strides[s] if b == 0 else 1)
        feats.append(x)

    mask = jnp.zeros(feats[-1].shape[:3], dtype=jnp.bool_)  # (N, H5, W5), all False

    # TODO(synk): position_embedding, self.neck (custom FPN) and transformer are
    # constructor-injected and not defined in the reference source.
    xs_nchw = [jnp.transpose(f, (0, 3, 1, 2)).astype(jnp.float32) for f in feats]
    return xs_nchw, mask


if __name__ == "__main__":
    key = jax.random.PRNGKey(0)
    k_bn, k_conv, k_params, k_img = jax.random.split(key, 4)

    # --- 1) FrozenBatchNorm2d (the spec module), exact check -------------------
    n, c, h, w = 2, 4, 16, 16
    kx, kw_, kb, km, kv = jax.random.split(k_bn, 5)
    x_bn = jax.random.normal(kx, (n, c, h, w), jnp.float32)
    gamma = jax.random.normal(kw_, (c,), jnp.float32)
    beta = jax.random.normal(kb, (c,), jnp.float32)
    rmean = jax.random.normal(km, (c,), jnp.float32)
    rvar = jax.random.uniform(kv, (c,), jnp.float32, minval=0.5, maxval=2.0)

    y = jax.jit(frozen_batchnorm2d)(x_bn, gamma, beta, rmean, rvar)
    jax.block_until_ready(y)
    scale = gamma * lax.rsqrt(rvar + EPS)
    bias = beta - rmean * scale
    y_ref = x_bn * scale.reshape(1, c, 1, 1) + bias.reshape(1, c, 1, 1)
    assert float(jnp.max(jnp.abs(y - y_ref))) <= 1e-5, "FrozenBatchNorm2d mismatch"

    # --- 2) fused conv+FrozenBN+ReLU kernel vs XLA conv reference --------------
    kcx, kcw = jax.random.split(k_conv)
    xc = jax.random.normal(kcx, (2, 16, 16, 8), jnp.float32).astype(COMPUTE_DTYPE)
    wconv = _init_conv(kcw, 64, 8, 3, 3)
    bn_t = (jnp.full((64,), 1.3, jnp.float32), jnp.full((64,), 0.2, jnp.float32),
            jnp.full((64,), -0.1, jnp.float32), jnp.full((64,), 0.9, jnp.float32))
    out_c = jax.jit(lambda a: conv_bn(a, wconv, bn_t, stride=1, padding=1, relu=True))(xc)
    jax.block_until_ready(out_c)

    scale_c = bn_t[0] * lax.rsqrt(bn_t[3] + EPS)
    bias_c = bn_t[1] - bn_t[2] * scale_c
    w_hwio = (jnp.transpose(wconv, (2, 3, 1, 0)) * scale_c[None, None, None, :]
              ).astype(COMPUTE_DTYPE).astype(jnp.float32)
    ref_c = lax.conv_general_dilated(
        xc.astype(jnp.float32), w_hwio, window_strides=(1, 1),
        padding=((1, 1), (1, 1)),
        dimension_numbers=("NHWC", "HWIO", "NHWC")) + bias_c
    ref_c = jnp.maximum(ref_c, 0.0)
    err = float(jnp.max(jnp.abs(out_c.astype(jnp.float32) - ref_c)))
    tol = 1e-2 * float(jnp.max(jnp.abs(ref_c))) + 1e-2
    assert err <= tol, f"conv_bn mismatch: {err} > {tol}"

    # --- 3) full backbone forward (shape / sanity checks) ----------------------
    params = make_resnet50_params(k_params)
    images = jax.random.normal(k_img, (2, 3, 64, 64), jnp.float32)  # NCHW like PyTorch
    xs, mask = backbone_forward(params, images)
    jax.block_until_ready(xs)
    jax.block_until_ready(mask)

    expected_channels = [64, 256, 512, 1024, 2048]
    expected_spatial = [16, 16, 8, 4, 2]
    for f, ch, sp in zip(xs, expected_channels, expected_spatial):
        assert f.shape == (2, ch, sp, sp), f.shape
    assert bool(jnp.isfinite(xs[-1]).all())
    assert mask.shape == (2, 2, 2) and mask.dtype == jnp.bool_
    assert not bool(mask.any())

    print("KERNEL_OK")
</pallas_src>

<mosaic_0001>
module attributes {stable_mosaic.version = 11 : i64} {
  func.func @_frozen_bn_kernel(%arg0: i32, %arg1: memref<512x4xf32, #tpu.memory_space<vmem>>, %arg2: memref<1x4xf32, #tpu.memory_space<vmem>>, %arg3: memref<1x4xf32, #tpu.memory_space<vmem>>, %arg4: memref<512x4xf32, #tpu.memory_space<vmem>>) attributes {dimension_semantics = [#tpu.dimension_semantics<parallel>], iteration_bounds = array<i64: 1>, scalar_prefetch = 0 : i64, scratch_operands = 0 : i64, tpu.core_type = #tpu.core_type<tc>, window_params = [{transform_indices = @transform_0, window_bounds = array<i64: 512, 4>}, {pipeline_mode = #tpu.pipeline_mode<synchronous>, transform_indices = @transform_1, window_bounds = array<i64: 1, 4>}, {pipeline_mode = #tpu.pipeline_mode<synchronous>, transform_indices = @transform_2, window_bounds = array<i64: 1, 4>}, {transform_indices = @transform_3, window_bounds = array<i64: 512, 4>}]} {
    %c0 = arith.constant 0 : index
    %c0_0 = arith.constant 0 : index
    %0 = vector.load %arg1[%c0, %c0_0] : memref<512x4xf32, #tpu.memory_space<vmem>>, vector<512x4xf32>
    %c0_1 = arith.constant 0 : index
    %c0_2 = arith.constant 0 : index
    %1 = vector.load %arg2[%c0_1, %c0_2] : memref<1x4xf32, #tpu.memory_space<vmem>>, vector<1x4xf32>
    %2 = vector.broadcast %1 : vector<1x4xf32> to vector<512x4xf32>
    %3 = arith.mulf %0, %2 : vector<512x4xf32>
    %c0_3 = arith.constant 0 : index
    %c0_4 = arith.constant 0 : index
    %4 = vector.load %arg3[%c0_3, %c0_4] : memref<1x4xf32, #tpu.memory_space<vmem>>, vector<1x4xf32>
    %5 = vector.broadcast %4 : vector<1x4xf32> to vector<512x4xf32>
    %6 = arith.addf %3, %5 : vector<512x4xf32>
    %c0_5 = arith.constant 0 : index
    %c0_6 = arith.constant 0 : index
    %7 = vector.load %arg4[%c0_5, %c0_6] : memref<512x4xf32, #tpu.memory_space<vmem>>, vector<512x4xf32>
    tpu.vector_store %arg4[%c0_5, %c0_6], %6 {strides = array<i32>} : memref<512x4xf32, #tpu.memory_space<vmem>>, vector<512x4xf32>,
    return
  }
  func.func @transform_0(%arg0: i32) -> (i32, i32) {
    %c0_i32 = arith.constant 0 : i32
    %c0_i32_0 = arith.constant 0 : i32
    return %arg0, %c0_i32 : i32, i32
  }
  func.func @transform_1(%arg0: i32) -> (i32, i32) {
    %c0_i32 = arith.constant 0 : i32
    %c0_i32_0 = arith.constant 0 : i32
    %c0_i32_1 = arith.constant 0 : i32
    return %c0_i32, %c0_i32_0 : i32, i32
  }
  func.func @transform_2(%arg0: i32) -> (i32, i32) {
    %c0_i32 = arith.constant 0 : i32
    %c0_i32_0 = arith.constant 0 : i32
    %c0_i32_1 = arith.constant 0 : i32
    return %c0_i32, %c0_i32_0 : i32, i32
  }
  func.func @transform_3(%arg0: i32) -> (i32, i32) {
    %c0_i32 = arith.constant 0 : i32
    %c0_i32_0 = arith.constant 0 : i32
    return %arg0, %c0_i32 : i32, i32
  }
}

</mosaic_0001>

<bundles_post_ra>
// kernel: frozen_batchnorm2d.1
= control target key start
LH: loop header
LB: loop body
LE: loop exit
PB: predicated region body
PF: predicated region fallthrough
CT: control target
= control target key end

     0   :  { %vm220_vm0 = vcmask 31744   ;;  %s897_s0 = inlined_call_operand.vmem [shape: f32[512,4], index: 0, kind: input, shape index: {}]   ;;  %s898_s1 = inlined_call_operand.vmem [shape: f32[1,4], index: 1, kind: input, shape index: {}]   ;;  %s899_s2 = inlined_call_operand.vmem [shape: f32[1,4], index: 2, kind: input, shape index: {}]   ;;  %s900_s3 = inlined_call_operand.vmem [shape: f32[512,4], index: 3, kind: output, shape index: {}]  }
   0x1   :  { %v14_v0 = vld [vmem:[%s897_s0] sm:$0xff]  ;;  %v15_v4 = vld [vmem:[%s897_s0 + $0x8] sm:$0xff]  ;;  %v16_v5 = vld [vmem:[%s897_s0 + $0x10] sm:$0xff] }
   0x2   :  { %v317_v1 = vld [vmem:[%s898_s1] ss:$0 sm:$0xff]  ;;  %v17_v6 = vld [vmem:[%s897_s0 + $0x18] sm:$0xff]  ;;  %v19_v11 = vld [vmem:[%s897_s0 + $0x28] sm:$0xff] }
   0x3   :  { %v322_v2 = vld [vmem:[%s899_s2] ss:$0 sm:$0xff]  ;;  %v85_v3 = vmul.f32 %v317_v1, %v14_v0  ;;  %v86_v7 = vmul.f32 %v317_v1, %v15_v4  ;;  %v87_v8 = vmul.f32 %v317_v1, %v16_v5  ;;  %v88_v9 = vmul.f32 %v317_v1, %v17_v6  ;;  %v20_v12 = vld [vmem:[%s897_s0 + $0x30] sm:$0xff]  ;;  %v21_v17 = vld [vmem:[%s897_s0 + $0x38] sm:$0xff] }
   0x4   :  { %v18_v10 = vld [vmem:[%s897_s0 + $0x20] sm:$0xff]  ;;  %v90_v15 = vmul.f32 %v317_v1, %v19_v11  ;;  %v91_v16 = vmul.f32 %v317_v1, %v20_v12  ;;  %v23_v19 = vld [vmem:[%s897_s0 + $0x48] sm:$0xff]  ;;  %v92_v23 = vmul.f32 %v317_v1, %v21_v17  ;;  %v24_v24 = vld [vmem:[%s897_s0 + $0x50] sm:$0xff] }
   0x5   :  { %v156_v13 = vadd.f32 %v322_v2, %v85_v3  ;;  %v89_v14 = vmul.f32 %v317_v1, %v18_v10  ;;  %v22_v18 = vld [vmem:[%s897_s0 + $0x40] sm:$0xff]  ;;  %v157_v20 = vadd.f32 %v322_v2, %v86_v7  ;;  %v158_v21 = vadd.f32 %v322_v2, %v87_v8  ;;  %v25_v25 = vld [vmem:[%s897_s0 + $0x58] sm:$0xff]  ;;  %v27_v31 = vld [vmem:[%s897_s0 + $0x68] sm:$0xff] }
   0x6   :  { %v159_v22 = vadd.f32 %v322_v2, %v88_v9  ;;  %v26_v26 = vld [vmem:[%s897_s0 + $0x60] sm:$0xff]  ;;  %v161_v28 = vadd.f32 %v322_v2, %v90_v15  ;;  %v162_v29 = vadd.f32 %v322_v2, %v91_v16  ;;  %v93_v30 = vmul.f32 %v317_v1, %v22_v18  ;;  %v28_v32 = vld [vmem:[%s897_s0 + $0x70] sm:$0xff]  ;;  %v29_v33 = vld [vmem:[%s897_s0 + $0x78] sm:$0xff] }
   0x7   :  { %221 = vst.msk [vmem:[%s900_s3] sm:$0xff] %vm220_vm0, %v156_v13  ;;  %v160_v27 = vadd.f32 %v322_v2, %v89_v14  ;;  %222 = vst.msk [vmem:[%s900_s3 + $0x8] sm:$0xff] %vm220_vm0, %v157_v20  ;;  %v163_v34 = vadd.f32 %v322_v2, %v92_v23  ;;  %v94_v35 = vmul.f32 %v317_v1, %v23_v19  ;;  %v30_v38 = vld [vmem:[%s897_s0 + $0x80] sm:$0xff]  ;;  %v31_v43 = vld [vmem:[%s897_s0 + $0x88] sm:$0xff] }
   0x8   :  { %223 = vst.msk [vmem:[%s900_s3 + $0x10] sm:$0xff] %vm220_vm0, %v158_v21  ;;  %224 = vst.msk [vmem:[%s900_s3 + $0x18] sm:$0xff] %vm220_vm0, %v159_v22  ;;  %v95_v36 = vmul.f32 %v317_v1, %v24_v24  ;;  %v96_v37 = vmul.f32 %v317_v1, %v25_v25  ;;  %v164_v39 = vadd.f32 %v322_v2, %v93_v30  ;;  %v32_v44 = vld [vmem:[%s897_s0 + $0x90] sm:$0xff]  ;;  %v33_v45 = vld [vmem:[%s897_s0 + $0x98] sm:$0xff] }
   0x9   :  { %225 = vst.msk [vmem:[%s900_s3 + $0x20] sm:$0xff] %vm220_vm0, %v160_v27  ;;  %226 = vst.msk [vmem:[%s900_s3 + $0x28] sm:$0xff] %vm220_vm0, %v161_v28  ;;  %v97_v40 = vmul.f32 %v317_v1, %v26_v26  ;;  %v98_v41 = vmul.f32 %v317_v1, %v27_v31  ;;  %v99_v42 = vmul.f32 %v317_v1, %v28_v32  ;;  %v34_v50 = vld [vmem:[%s897_s0 + $0xa0] sm:$0xff]  ;;  %v35_v51 = vld [vmem:[%s897_s0 + $0xa8] sm:$0xff] }
   0xa   :  { %227 = vst.msk [vmem:[%s900_s3 + $0x30] sm:$0xff] %vm220_vm0, %v162_v29  ;;  %228 = vst.msk [vmem:[%s900_s3 + $0x38] sm:$0xff] %vm220_vm0, %v163_v34  ;;  %v165_v46 = vadd.f32 %v322_v2, %v94_v35  ;;  %v166_v47 = vadd.f32 %v322_v2, %v95_v36  ;;  %v167_v48 = vadd.f32 %v322_v2, %v96_v37  ;;  %v36_v52 = vld [vmem:[%s897_s0 + $0xb0] sm:$0xff]  ;;  %v37_v57 = vld [vmem:[%s897_s0 + $0xb8] sm:$0xff] }
   0xb   :  { %v100_v49 = vmul.f32 %v317_v1, %v29_v33  ;;  %229 = vst.msk [vmem:[%s900_s3 + $0x40] sm:$0xff] %vm220_vm0, %v164_v39  ;;  %v168_v53 = vadd.f32 %v322_v2, %v97_v40  ;;  %v169_v54 = vadd.f32 %v322_v2, %v98_v41  ;;  %v170_v55 = vadd.f32 %v322_v2, %v99_v42  ;;  %v38_v62 = vld [vmem:[%s897_s0 + $0xc0] sm:$0xff]  ;;  %v39_v5 = vld [vmem:[%s897_s0 + $0xc8] sm:$0xff]  ;;  %v40_v6 = vld [vmem:[%s897_s0 + $0xd0] sm:$0xff] }
   0xc   :  { %v101_v56 = vmul.f32 %v317_v1, %v30_v38  ;;  %230 = vst.msk [vmem:[%s900_s3 + $0x48] sm:$0xff] %vm220_vm0, %v165_v46  ;;  %231 = vst.msk [vmem:[%s900_s3 + $0x50] sm:$0xff] %vm220_vm0, %v166_v47  ;;  %v102_v59 = vmul.f32 %v317_v1, %v31_v43  ;;  %v103_v60 = vmul.f32 %v317_v1, %v32_v44  ;;  %v41_v7 = vld [vmem:[%s897_s0 + $0xd8] sm:$0xff]  ;;  %v42_v12 = vld [vmem:[%s897_s0 + $0xe0] sm:$0xff] }
   0xd   :  { %232 = vst.msk [vmem:[%s900_s3 + $0x58] sm:$0xff] %vm220_vm0, %v167_v48  ;;  %v171_v58 = vadd.f32 %v322_v2, %v100_v49  ;;  %v104_v61 = vmul.f32 %v317_v1, %v33_v45  ;;  %233 = vst.msk [vmem:[%s900_s3 + $0x60] sm:$0xff] %vm220_vm0, %v168_v53  ;;  %v105_v0 = vmul.f32 %v317_v1, %v34_v50  ;;  %v43_v13 = vld [vmem:[%s897_s0 + $0xe8] sm:$0xff]  ;;  %v44_v14 = vld [vmem:[%s897_s0 + $0xf0] sm:$0xff] }
   0xe   :  { %234 = vst.msk [vmem:[%s900_s3 + $0x68] sm:$0xff] %vm220_vm0, %v169_v54  ;;  %235 = vst.msk [vmem:[%s900_s3 + $0x70] sm:$0xff] %vm220_vm0, %v170_v55  ;;  %v172_v63 = vadd.f32 %v322_v2, %v101_v56  ;;  %v106_v3 = vmul.f32 %v317_v1, %v35_v51  ;;  %v107_v4 = vmul.f32 %v317_v1, %v36_v52  ;;  %v45_v19 = vld [vmem:[%s897_s0 + $0xf8] sm:$0xff]  ;;  %v46_v24 = vld [vmem:[%s897_s0 + $0x100] sm:$0xff] }
   0xf   :  { %236 = vst.msk [vmem:[%s900_s3 + $0x78] sm:$0xff] %vm220_vm0, %v171_v58  ;;  %v173_v8 = vadd.f32 %v322_v2, %v102_v59  ;;  %v174_v9 = vadd.f32 %v322_v2, %v103_v60  ;;  %v175_v10 = vadd.f32 %v322_v2, %v104_v61  ;;  %v108_v11 = vmul.f32 %v317_v1, %v37_v57  ;;  %v47_v29 = vld [vmem:[%s897_s0 + $0x108] sm:$0xff]  ;;  %v48_v30 = vld [vmem:[%s897_s0 + $0x110] sm:$0xff]  ;;  %v49_v31 = vld [vmem:[%s897_s0 + $0x118] sm:$0xff] }
  0x10   :  { %237 = vst.msk [vmem:[%s900_s3 + $0x80] sm:$0xff] %vm220_vm0, %v172_v63  ;;  %v176_v15 = vadd.f32 %v322_v2, %v105_v0  ;;  %v177_v16 = vadd.f32 %v322_v2, %v106_v3  ;;  %v178_v17 = vadd.f32 %v322_v2, %v107_v4  ;;  %v109_v18 = vmul.f32 %v317_v1, %v38_v62  ;;  %v50_v36 = vld [vmem:[%s897_s0 + $0x120] sm:$0xff]  ;;  %v51_v37 = vld [vmem:[%s897_s0 + $0x128] sm:$0xff]  ;;  %v52_v38 = vld [vmem:[%s897_s0 + $0x130] sm:$0xff] }
  0x11   :  { %238 = vst.msk [vmem:[%s900_s3 + $0x88] sm:$0xff] %vm220_vm0, %v173_v8  ;;  %239 = vst.msk [vmem:[%s900_s3 + $0x90] sm:$0xff] %vm220_vm0, %v174_v9  ;;  %v179_v20 = vadd.f32 %v322_v2, %v108_v11  ;;  %v110_v21 = vmul.f32 %v317_v1, %v39_v5  ;;  %v111_v22 = vmul.f32 %v317_v1, %v40_v6  ;;  %v53_v43 = vld [vmem:[%s897_s0 + $0x138] sm:$0xff]  ;;  %v54_v48 = vld [vmem:[%s897_s0 + $0x140] sm:$0xff] }
  0x12   :  { %240 = vst.msk [vmem:[%s900_s3 + $0x98] sm:$0xff] %vm220_vm0, %v175_v10  ;;  %v112_v23 = vmul.f32 %v317_v1, %v41_v7  ;;  %241 = vst.msk [vmem:[%s900_s3 + $0xa0] sm:$0xff] %vm220_vm0, %v176_v15  ;;  %v180_v25 = vadd.f32 %v322_v2, %v109_v18  ;;  %v113_v26 = vmul.f32 %v317_v1, %v42_v12  ;;  %v55_v53 = vld [vmem:[%s897_s0 + $0x148] sm:$0xff]  ;;  %v56_v54 = vld [vmem:[%s897_s0 + $0x150] sm:$0xff] }
  0x13   :  { %242 = vst.msk [vmem:[%s900_s3 + $0xa8] sm:$0xff] %vm220_vm0, %v177_v16  ;;  %243 = vst.msk [vmem:[%s900_s3 + $0xb0] sm:$0xff] %vm220_vm0, %v178_v17  ;;  %v114_v27 = vmul.f32 %v317_v1, %v43_v13  ;;  %v115_v28 = vmul.f32 %v317_v1, %v44_v14  ;;  %v181_v32 = vadd.f32 %v322_v2, %v110_v21  ;;  %v57_v55 = vld [vmem:[%s897_s0 + $0x158] sm:$0xff]  ;;  %v58_v60 = vld [vmem:[%s897_s0 + $0x160] sm:$0xff] }
  0x14   :  { %244 = vst.msk [vmem:[%s900_s3 + $0xb8] sm:$0xff] %vm220_vm0, %v179_v20  ;;  %v182_v33 = vadd.f32 %v322_v2, %v111_v22  ;;  %v183_v34 = vadd.f32 %v322_v2, %v112_v23  ;;  %v116_v35 = vmul.f32 %v317_v1, %v45_v19  ;;  %245 = vst.msk [vmem:[%s900_s3 + $0xc0] sm:$0xff] %vm220_vm0, %v180_v25  ;;  %v59_v61 = vld [vmem:[%s897_s0 + $0x168] sm:$0xff]  ;;  %v60_v62 = vld [vmem:[%s897_s0 + $0x170] sm:$0xff] }
  0x15   :  { %v184_v39 = vadd.f32 %v322_v2, %v113_v26  ;;  %v185_v40 = vadd.f32 %v322_v2, %v114_v27  ;;  %v186_v41 = vadd.f32 %v322_v2, %v115_v28  ;;  %v117_v42 = vmul.f32 %v317_v1, %v46_v24  ;;  %246 = vst.msk [vmem:[%s900_s3 + $0xc8] sm:$0xff] %vm220_vm0, %v181_v32  ;;  %v61_v5 = vld [vmem:[%s897_s0 + $0x178] sm:$0xff]  ;;  %v62_v10 = vld [vmem:[%s897_s0 + $0x180] sm:$0xff]  ;;  %v63_v15 = vld [vmem:[%s897_s0 + $0x188] sm:$0xff] }
  0x16   :  { %247 = vst.msk [vmem:[%s900_s3 + $0xd0] sm:$0xff] %vm220_vm0, %v182_v33  ;;  %248 = vst.msk [vmem:[%s900_s3 + $0xd8] sm:$0xff] %vm220_vm0, %v183_v34  ;;  %v187_v44 = vadd.f32 %v322_v2, %v116_v35  ;;  %v118_v45 = vmul.f32 %v317_v1, %v47_v29  ;;  %v119_v46 = vmul.f32 %v317_v1, %v48_v30  ;;  %v64_v16 = vld [vmem:[%s897_s0 + $0x190] sm:$0xff]  ;;  %v65_v17 = vld [vmem:[%s897_s0 + $0x198] sm:$0xff] }
  0x17   :  { %v120_v47 = vmul.f32 %v317_v1, %v49_v31  ;;  %249 = vst.msk [vmem:[%s900_s3 + $0xe0] sm:$0xff] %vm220_vm0, %v184_v39  ;;  %250 = vst.msk [vmem:[%s900_s3 + $0xe8] sm:$0xff] %vm220_vm0, %v185_v40  ;;  %v188_v49 = vadd.f32 %v322_v2, %v117_v42  ;;  %v121_v50 = vmul.f32 %v317_v1, %v50_v36  ;;  %v66_v22 = vld [vmem:[%s897_s0 + $0x1a0] sm:$0xff]  ;;  %v67_v23 = vld [vmem:[%s897_s0 + $0x1a8] sm:$0xff] }
  0x18   :  { %251 = vst.msk [vmem:[%s900_s3 + $0xf0] sm:$0xff] %vm220_vm0, %v186_v41  ;;  %v122_v51 = vmul.f32 %v317_v1, %v51_v37  ;;  %v123_v52 = vmul.f32 %v317_v1, %v52_v38  ;;  %252 = vst.msk [vmem:[%s900_s3 + $0xf8] sm:$0xff] %vm220_vm0, %v187_v44  ;;  %v189_v56 = vadd.f32 %v322_v2, %v118_v45  ;;  %v68_v24 = vld [vmem:[%s897_s0 + $0x1b0] sm:$0xff]  ;;  %v69_v29 = vld [vmem:[%s897_s0 + $0x1b8] sm:$0xff] }
  0x19   :  { %v190_v57 = vadd.f32 %v322_v2, %v119_v46  ;;  %v191_v58 = vadd.f32 %v322_v2, %v120_v47  ;;  %v124_v59 = vmul.f32 %v317_v1, %v53_v43  ;;  %253 = vst.msk [vmem:[%s900_s3 + $0x100] sm:$0xff] %vm220_vm0, %v188_v49  ;;  %v192_v63 = vadd.f32 %v322_v2, %v121_v50  ;;  %v70_v34 = vld [vmem:[%s897_s0 + $0x1c0] sm:$0xff]  ;;  %v71_v39 = vld [vmem:[%s897_s0 + $0x1c8] sm:$0xff]  ;;  %v72_v40 = vld [vmem:[%s897_s0 + $0x1d0] sm:$0xff] }
  0x1a   :  { %v193_v0 = vadd.f32 %v322_v2, %v122_v51  ;;  %v194_v3 = vadd.f32 %v322_v2, %v123_v52  ;;  %v125_v4 = vmul.f32 %v317_v1, %v54_v48  ;;  %254 = vst.msk [vmem:[%s900_s3 + $0x108] sm:$0xff] %vm220_vm0, %v189_v56  ;;  %v126_v7 = vmul.f32 %v317_v1, %v55_v53  ;;  %v73_v41 = vld [vmem:[%s897_s0 + $0x1d8] sm:$0xff]  ;;  %v74_v46 = vld [vmem:[%s897_s0 + $0x1e0] sm:$0xff]  ;;  %v75_v47 = vld [vmem:[%s897_s0 + $0x1e8] sm:$0xff] }
  0x1b   :  { %255 = vst.msk [vmem:[%s900_s3 + $0x110] sm:$0xff] %vm220_vm0, %v190_v57  ;;  %256 = vst.msk [vmem:[%s900_s3 + $0x118] sm:$0xff] %vm220_vm0, %v191_v58  ;;  %v195_v6 = vadd.f32 %v322_v2, %v124_v59  ;;  %v127_v8 = vmul.f32 %v317_v1, %v56_v54  ;;  %v128_v9 = vmul.f32 %v317_v1, %v57_v55  ;;  %v76_v48 = vld [vmem:[%s897_s0 + $0x1f0] sm:$0xff]  ;;  %v77_v53 = vld [vmem:[%s897_s0 + $0x1f8] sm:$0xff] }
  0x1c   :  { %257 = vst.msk [vmem:[%s900_s3 + $0x120] sm:$0xff] %vm220_vm0, %v192_v63  ;;  %258 = vst.msk [vmem:[%s900_s3 + $0x128] sm:$0xff] %vm220_vm0, %v193_v0  ;;  %v196_v11 = vadd.f32 %v322_v2, %v125_v4  ;;  %v129_v12 = vmul.f32 %v317_v1, %v58_v60  ;;  %v130_v13 = vmul.f32 %v317_v1, %v59_v61 }
  0x1d   :  { %259 = vst.msk [vmem:[%s900_s3 + $0x130] sm:$0xff] %vm220_vm0, %v194_v3  ;;  %v131_v14 = vmul.f32 %v317_v1, %v60_v62  ;;  %260 = vst.msk [vmem:[%s900_s3 + $0x138] sm:$0xff] %vm220_vm0, %v195_v6  ;;  %v197_v18 = vadd.f32 %v322_v2, %v126_v7  ;;  %v198_v19 = vadd.f32 %v322_v2, %v127_v8 }
  0x1e   :  { %v199_v20 = vadd.f32 %v322_v2, %v128_v9  ;;  %v132_v21 = vmul.f32 %v317_v1, %v61_v5  ;;  %261 = vst.msk [vmem:[%s900_s3 + $0x140] sm:$0xff] %vm220_vm0, %v196_v11  ;;  %v200_v25 = vadd.f32 %v322_v2, %v129_v12  ;;  %v201_v26 = vadd.f32 %v322_v2, %v130_v13 }
  0x1f   :  { %v202_v27 = vadd.f32 %v322_v2, %v131_v14  ;;  %v133_v28 = vmul.f32 %v317_v1, %v62_v10  ;;  %262 = vst.msk [vmem:[%s900_s3 + $0x148] sm:$0xff] %vm220_vm0, %v197_v18  ;;  %263 = vst.msk [vmem:[%s900_s3 + $0x150] sm:$0xff] %vm220_vm0, %v198_v19  ;;  %v134_v31 = vmul.f32 %v317_v1, %v63_v15 }
  0x20   :  { %264 = vst.msk [vmem:[%s900_s3 + $0x158] sm:$0xff] %vm220_vm0, %v199_v20  ;;  %v203_v30 = vadd.f32 %v322_v2, %v132_v21  ;;  %v135_v32 = vmul.f32 %v317_v1, %v64_v16  ;;  %v136_v33 = vmul.f32 %v317_v1, %v65_v17  ;;  %265 = vst.msk [vmem:[%s900_s3 + $0x160] sm:$0xff] %vm220_vm0, %v200_v25 }
  0x21   :  { %266 = vst.msk [vmem:[%s900_s3 + $0x168] sm:$0xff] %vm220_vm0, %v201_v26  ;;  %267 = vst.msk [vmem:[%s900_s3 + $0x170] sm:$0xff] %vm220_vm0, %v202_v27  ;;  %v204_v35 = vadd.f32 %v322_v2, %v133_v28  ;;  %v137_v36 = vmul.f32 %v317_v1, %v66_v22  ;;  %v138_v37 = vmul.f32 %v317_v1, %v67_v23 }
  0x22   :  { %v139_v38 = vmul.f32 %v317_v1, %v68_v24  ;;  %268 = vst.msk [vmem:[%s900_s3 + $0x178] sm:$0xff] %vm220_vm0, %v203_v30  ;;  %v205_v42 = vadd.f32 %v322_v2, %v134_v31  ;;  %v206_v43 = vadd.f32 %v322_v2, %v135_v32  ;;  %v207_v44 = vadd.f32 %v322_v2, %v136_v33 }
  0x23   :  { %v140_v45 = vmul.f32 %v317_v1, %v69_v29  ;;  %269 = vst.msk [vmem:[%s900_s3 + $0x180] sm:$0xff] %vm220_vm0, %v204_v35  ;;  %v208_v49 = vadd.f32 %v322_v2, %v137_v36  ;;  %v209_v50 = vadd.f32 %v322_v2, %v138_v37  ;;  %v141_v52 = vmul.f32 %v317_v1, %v70_v34 }
  0x24   :  { %v210_v51 = vadd.f32 %v322_v2, %v139_v38  ;;  %270 = vst.msk [vmem:[%s900_s3 + $0x188] sm:$0xff] %vm220_vm0, %v205_v42  ;;  %271 = vst.msk [vmem:[%s900_s3 + $0x190] sm:$0xff] %vm220_vm0, %v206_v43  ;;  %v142_v55 = vmul.f32 %v317_v1, %v71_v39  ;;  %v143_v56 = vmul.f32 %v317_v1, %v72_v40 }
  0x25   :  { %272 = vst.msk [vmem:[%s900_s3 + $0x198] sm:$0xff] %vm220_vm0, %v207_v44  ;;  %v211_v54 = vadd.f32 %v322_v2, %v140_v45  ;;  %v144_v57 = vmul.f32 %v317_v1, %v73_v41  ;;  %273 = vst.msk [vmem:[%s900_s3 + $0x1a0] sm:$0xff] %vm220_vm0, %v208_v49  ;;  %v212_v58 = vadd.f32 %v322_v2, %v141_v52 }
  0x26   :  { %274 = vst.msk [vmem:[%s900_s3 + $0x1a8] sm:$0xff] %vm220_vm0, %v209_v50  ;;  %275 = vst.msk [vmem:[%s900_s3 + $0x1b0] sm:$0xff] %vm220_vm0, %v210_v51  ;;  %v145_v59 = vmul.f32 %v317_v1, %v74_v46  ;;  %v146_v60 = vmul.f32 %v317_v1, %v75_v47  ;;  %v147_v61 = vmul.f32 %v317_v1, %v76_v48 }
  0x27   :  { %276 = vst.msk [vmem:[%s900_s3 + $0x1b8] sm:$0xff] %vm220_vm0, %v211_v54  ;;  %v213_v62 = vadd.f32 %v322_v2, %v142_v55  ;;  %v214_v63 = vadd.f32 %v322_v2, %v143_v56  ;;  %v215_v0 = vadd.f32 %v322_v2, %v144_v57  ;;  %v148_v3 = vmul.f32 %v317_v1, %v77_v53 }
  0x28   :  { %277 = vst.msk [vmem:[%s900_s3 + $0x1c0] sm:$0xff] %vm220_vm0, %v212_v58  ;;  %v216_v4 = vadd.f32 %v322_v2, %v145_v59  ;;  %v217_v5 = vadd.f32 %v322_v2, %v146_v60  ;;  %v218_v6 = vadd.f32 %v322_v2, %v147_v61 }
  0x29   :  { %278 = vst.msk [vmem:[%s900_s3 + $0x1c8] sm:$0xff] %vm220_vm0, %v213_v62  ;;  %279 = vst.msk [vmem:[%s900_s3 + $0x1d0] sm:$0xff] %vm220_vm0, %v214_v63  ;;  %v219_v1 = vadd.f32 %v322_v2, %v148_v3 }
  0x2a   :  { %280 = vst.msk [vmem:[%s900_s3 + $0x1d8] sm:$0xff] %vm220_vm0, %v215_v0  ;;  %281 = vst.msk [vmem:[%s900_s3 + $0x1e0] sm:$0xff] %vm220_vm0, %v216_v4 }
  0x2b   :  { %282 = vst.msk [vmem:[%s900_s3 + $0x1e8] sm:$0xff] %vm220_vm0, %v217_v5  ;;  %283 = vst.msk [vmem:[%s900_s3 + $0x1f0] sm:$0xff] %vm220_vm0, %v218_v6 }
  0x2c   :  { %284 = vst.msk [vmem:[%s900_s3 + $0x1f8] sm:$0xff] %vm220_vm0, %v219_v1 }

</bundles_post_ra>
